<compile_context>
chip_gen: v7x
topology: tpu7x:2x2x1
jax: 0.10.0
libtpu: 0.0.40
codegen_flags: <defaults>
</compile_context>

<pallas_src>
import functools
import math

import jax
import jax.numpy as jnp
from jax import lax
from jax.experimental import pallas as pl
from jax.experimental.pallas import tpu as pltpu

_LANES = 128  # lane-dense output width


# ------------------------------ Fused kernel ------------------------------- #

def _fused_net_transformer_kernel(
    x_ref, adj_ref, w1_ref, b1_ref, w2_ref, b2_ref, o_ref, out1_ref,
    *, heads, nhid, nclass,
):
    x = x_ref[...]        # (N, NFEAT)
    adj = adj_ref[...]    # (N, N); row i = target, col j = source

    # Additive attention-mask bias: computed ONCE, reused by every head of both layers.
    attn_bias = jnp.where(adj > 0.0, 0.0, jnp.float32(-1e30))   # (N, N)

    def masked_attention(q, k, v):
        # 1/sqrt(d) scale is already folded into the q projection weights/bias.
        # Contract the feature axis of q and k directly (no materialized k.T).
        s = lax.dot_general(
            q, k, dimension_numbers=(((1,), (1,)), ((), ())),
            preferred_element_type=jnp.float32,
        )
        s = s + attn_bias
        m = jnp.max(s, axis=-1, keepdims=True)
        e = jnp.exp(s - m)                       # masked entries underflow to exactly 0
        denom = jnp.sum(e, axis=-1, keepdims=True)   # >= 1 thanks to self-loops
        attn = e * pl.reciprocal(denom, approx=True)  # divide on EUP, frees VALU slots
        return jnp.dot(attn, v, preferred_element_type=jnp.float32)

    # ------------- conv1: TransformerConv(nfeat, nhid, heads), concat=True -------------
    hc = heads * nhid
    # Single fused projection [q | k | v | skip]: lane-dense (N, 4*H*C) = (N, 128) output.
    z1 = jnp.dot(x, w1_ref[...], preferred_element_type=jnp.float32) + b1_ref[...]
    q1 = z1[:, 0 * hc:1 * hc]
    k1 = z1[:, 1 * hc:2 * hc]
    v1 = z1[:, 2 * hc:3 * hc]
    skip1 = z1[:, 3 * hc:4 * hc]

    # Heads unrolled at trace time; PyG view(N, H, C) is head-major, so head h occupies
    # lane slice [h*C, (h+1)*C). Each head writes its result in place (no lane concat).
    for h in range(heads):
        sl = slice(h * nhid, (h + 1) * nhid)
        out1_ref[:, sl] = masked_attention(q1[:, sl], k1[:, sl], v1[:, sl])
    out1 = out1_ref[...] + skip1                                   # (N, heads*nhid)
    # TODO(synk): F.dropout in training mode (RNG mask) not reproduced; eval-mode identity.

    # ------------- conv2: TransformerConv(heads*nhid, nclass), heads=1 -------------
    z2 = jnp.dot(out1, w2_ref[...], preferred_element_type=jnp.float32) + b2_ref[...]
    q2 = z2[:, 0 * nclass:1 * nclass]
    k2 = z2[:, 1 * nclass:2 * nclass]
    v2 = z2[:, 2 * nclass:3 * nclass]
    skip2 = z2[:, 3 * nclass:4 * nclass]

    out2 = masked_attention(q2, k2, v2) + skip2                    # (N, nclass)

    # -------------------------- log_softmax over dim=1 --------------------------
    m2 = jnp.max(out2, axis=1, keepdims=True)
    lse = jnp.log(jnp.sum(jnp.exp(out2 - m2), axis=1, keepdims=True)) + m2
    logp = out2 - lse

    # Lane-dense output slab: (N, 128) with log-probs in the first nclass lanes.
    o_ref[...] = jnp.zeros_like(o_ref)
    o_ref[:, :nclass] = logp


# ------------------------------ Wrapper ------------------------------------ #

_VMEM = pl.BlockSpec(memory_space=pltpu.MemorySpace.VMEM)


def net_transformer_forward(x, adj, fused_params, heads, nhid, nclass):
    """Full NetTransformer forward in one pallas_call. Returns [N, nclass] log-probs."""
    n = x.shape[0]
    kernel = functools.partial(
        _fused_net_transformer_kernel, heads=heads, nhid=nhid, nclass=nclass
    )
    out_pad = pl.pallas_call(
        kernel,
        out_shape=jax.ShapeDtypeStruct((n, _LANES), jnp.float32),  # lane-dense slab
        in_specs=[_VMEM] * 6,
        out_specs=_VMEM,
        scratch_shapes=[pltpu.VMEM((n, heads * nhid), jnp.float32)],  # per-head out slab
    )(
        x,
        adj,
        fused_params["w1"],
        fused_params["b1"],
        fused_params["w2"],
        fused_params["b2"],
    )
    return out_pad[:, :nclass]


# ------------------------------ Param helpers ------------------------------ #

def _make_layer_params(key, fin, fout_total):
    """Torch-layout params: w* are (fout, fin), b* are (fout,)."""
    ks = jax.random.split(key, 8)
    s = 0.1
    return {
        "wq": s * jax.random.normal(ks[0], (fout_total, fin), jnp.float32),
        "bq": s * jax.random.normal(ks[1], (fout_total,), jnp.float32),
        "wk": s * jax.random.normal(ks[2], (fout_total, fin), jnp.float32),
        "bk": s * jax.random.normal(ks[3], (fout_total,), jnp.float32),
        "wv": s * jax.random.normal(ks[4], (fout_total, fin), jnp.float32),
        "bv": s * jax.random.normal(ks[5], (fout_total,), jnp.float32),
        "ws": s * jax.random.normal(ks[6], (fout_total, fin), jnp.float32),
        "bs": s * jax.random.normal(ks[7], (fout_total,), jnp.float32),
    }


def _fuse_layer_params(p, head_dim):
    """One-time prep: pre-transpose, fold 1/sqrt(d) into the q projection, and concat
    [q | k | v | skip] along the output dim."""
    scale = 1.0 / math.sqrt(float(head_dim))
    w = jnp.concatenate(
        [p["wq"].T * scale, p["wk"].T, p["wv"].T, p["ws"].T], axis=1
    )                                                                  # (Fin, 4*Fout)
    b = jnp.concatenate(
        [p["bq"] * scale, p["bk"], p["bv"], p["bs"]]
    ).reshape(1, -1)                                                   # (1, 4*Fout)
    return w, b


# --------------------------------- Main ------------------------------------ #

if __name__ == "__main__":
    # Small shapes consistent with the module: N nodes, nfeat features.
    N, NFEAT, NHID, NCLASS, HEADS = 16, 8, 8, 4, 4
    DROPOUT = 0.5  # unused at eval time

    key = jax.random.PRNGKey(0)
    kx, kadj, k1, k2 = jax.random.split(key, 4)

    x = jax.random.normal(kx, (N, NFEAT), jnp.float32)
    # Random directed graph + self loops so every node has at least one incoming edge
    # (required for the additive -1e30 mask-bias formulation to match the reference).
    adj = (jax.random.uniform(kadj, (N, N)) < 0.3).astype(jnp.float32)
    adj = jnp.clip(adj + jnp.eye(N, dtype=jnp.float32), 0.0, 1.0)

    p1 = _make_layer_params(k1, NFEAT, HEADS * NHID)
    p2 = _make_layer_params(k2, HEADS * NHID, NCLASS)
    w1, b1 = _fuse_layer_params(p1, NHID)     # (8, 128), (1, 128)
    w2, b2 = _fuse_layer_params(p2, NCLASS)   # (32, 16), (1, 16)
    fused_params = {"w1": w1, "b1": b1, "w2": w2, "b2": b2}

    out = net_transformer_forward(x, adj, fused_params, HEADS, NHID, NCLASS)
    out = jax.block_until_ready(out)
    assert out.shape == (N, NCLASS)
    assert bool(jnp.all(jnp.isfinite(out)))
    # log_softmax rows must (approximately) normalize to 1 in prob space.
    assert bool(jnp.all(jnp.abs(jnp.sum(jnp.exp(out), axis=1) - 1.0) < 1e-2))
    print("KERNEL_OK")
</pallas_src>

<mosaic_0001>
module attributes {stable_mosaic.version = 11 : i64} {
  func.func @_fused_net_transformer_kernel(%arg0: memref<16x8xf32, #tpu.memory_space<vmem>>, %arg1: memref<16x16xf32, #tpu.memory_space<vmem>>, %arg2: memref<8x128xf32, #tpu.memory_space<vmem>>, %arg3: memref<1x128xf32, #tpu.memory_space<vmem>>, %arg4: memref<32x16xf32, #tpu.memory_space<vmem>>, %arg5: memref<1x16xf32, #tpu.memory_space<vmem>>, %arg6: memref<16x128xf32, #tpu.memory_space<vmem>>, %arg7: memref<16x32xf32, #tpu.memory_space<vmem>>) attributes {dimension_semantics = [], scalar_prefetch = 0 : i64, scratch_operands = 1 : i64, tpu.core_type = #tpu.core_type<tc>} {
    %c0 = arith.constant 0 : index
    %c0_0 = arith.constant 0 : index
    %0 = vector.load %arg0[%c0, %c0_0] : memref<16x8xf32, #tpu.memory_space<vmem>>, vector<16x8xf32>
    %c0_1 = arith.constant 0 : index
    %c0_2 = arith.constant 0 : index
    %1 = vector.load %arg1[%c0_1, %c0_2] : memref<16x16xf32, #tpu.memory_space<vmem>>, vector<16x16xf32>
    %cst = arith.constant 0.000000e+00 : f32
    %2 = vector.broadcast %cst : f32 to vector<16x16xf32>
    %3 = arith.cmpf ogt, %1, %2 : vector<16x16xf32>
    %cst_3 = arith.constant 0.000000e+00 : f32
    %cst_4 = arith.constant -1.000000e+30 : f32
    %4 = vector.broadcast %cst_3 : f32 to vector<16x16xf32>
    %5 = vector.broadcast %cst_4 : f32 to vector<16x16xf32>
    %6 = arith.select %3, %4, %5 : vector<16x16xi1>, vector<16x16xf32>
    %c0_5 = arith.constant 0 : index
    %c0_6 = arith.constant 0 : index
    %7 = vector.load %arg2[%c0_5, %c0_6] : memref<8x128xf32, #tpu.memory_space<vmem>>, vector<8x128xf32>
    %cst_7 = arith.constant dense<0.000000e+00> : vector<16x128xf32>
    %8 = tpu.matmul %0, %7, %cst_7 {dimension_numbers = #tpu.dot_dimension_numbers<[1], [0], [0], [1], [0, 0, 1, 1], [], []>} : vector<16x8xf32>, vector<8x128xf32>, vector<16x128xf32> -> vector<16x128xf32>
    %c0_8 = arith.constant 0 : index
    %c0_9 = arith.constant 0 : index
    %9 = vector.load %arg3[%c0_8, %c0_9] : memref<1x128xf32, #tpu.memory_space<vmem>>, vector<1x128xf32>
    %10 = vector.broadcast %9 : vector<1x128xf32> to vector<16x128xf32>
    %11 = arith.addf %8, %10 : vector<16x128xf32>
    %12 = vector.extract_strided_slice %11 {offsets = [0, 0], sizes = [16, 32], strides = [1, 1]} : vector<16x128xf32> to vector<16x32xf32>
    %13 = vector.extract_strided_slice %11 {offsets = [0, 32], sizes = [16, 32], strides = [1, 1]} : vector<16x128xf32> to vector<16x32xf32>
    %14 = vector.extract_strided_slice %11 {offsets = [0, 64], sizes = [16, 32], strides = [1, 1]} : vector<16x128xf32> to vector<16x32xf32>
    %15 = vector.extract_strided_slice %11 {offsets = [0, 96], sizes = [16, 32], strides = [1, 1]} : vector<16x128xf32> to vector<16x32xf32>
    %16 = vector.extract_strided_slice %12 {offsets = [0, 0], sizes = [16, 8], strides = [1, 1]} : vector<16x32xf32> to vector<16x8xf32>
    %17 = vector.extract_strided_slice %13 {offsets = [0, 0], sizes = [16, 8], strides = [1, 1]} : vector<16x32xf32> to vector<16x8xf32>
    %18 = vector.extract_strided_slice %14 {offsets = [0, 0], sizes = [16, 8], strides = [1, 1]} : vector<16x32xf32> to vector<16x8xf32>
    %cst_10 = arith.constant dense<0.000000e+00> : vector<16x16xf32>
    %19 = tpu.matmul %16, %17, %cst_10 {dimension_numbers = #tpu.dot_dimension_numbers<[1], [1], [0], [0], [0, 0, 1, 0], [], []>} : vector<16x8xf32>, vector<16x8xf32>, vector<16x16xf32> -> vector<16x16xf32>
    %20 = arith.addf %19, %6 : vector<16x16xf32>
    %cst_11 = arith.constant dense<0xFF800000> : vector<16xf32>
    %21 = vector.multi_reduction <maximumf>, %20, %cst_11 [1] : vector<16x16xf32> to vector<16xf32>
    %22 = vector.shape_cast %21 : vector<16xf32> to vector<16x1xf32>
    %23 = vector.broadcast %22 : vector<16x1xf32> to vector<16x16xf32>
    %24 = arith.subf %20, %23 : vector<16x16xf32>
    %25 = math.exp %24 : vector<16x16xf32>
    %cst_12 = arith.constant dense<0.000000e+00> : vector<16xf32>
    %26 = vector.multi_reduction <add>, %25, %cst_12 [1] : vector<16x16xf32> to vector<16xf32>
    %27 = vector.shape_cast %26 : vector<16xf32> to vector<16x1xf32>
    %28 = tpu.reciprocal %27 {approx = true} : vector<16x1xf32> -> vector<16x1xf32>
    %29 = vector.broadcast %28 : vector<16x1xf32> to vector<16x16xf32>
    %30 = arith.mulf %25, %29 : vector<16x16xf32>
    %cst_13 = arith.constant dense<0.000000e+00> : vector<16x8xf32>
    %31 = tpu.matmul %30, %18, %cst_13 {dimension_numbers = #tpu.dot_dimension_numbers<[1], [0], [0], [1], [0, 0, 1, 1], [], []>} : vector<16x16xf32>, vector<16x8xf32>, vector<16x8xf32> -> vector<16x8xf32>
    %c0_14 = arith.constant 0 : index
    %c0_15 = arith.constant 0 : index
    %32 = vector.load %arg7[%c0_14, %c0_15] : memref<16x32xf32, #tpu.memory_space<vmem>>, vector<16x8xf32>
    tpu.vector_store %arg7[%c0_14, %c0_15], %31 {strides = array<i32>} : memref<16x32xf32, #tpu.memory_space<vmem>>, vector<16x8xf32>,
    %33 = vector.extract_strided_slice %12 {offsets = [0, 8], sizes = [16, 8], strides = [1, 1]} : vector<16x32xf32> to vector<16x8xf32>
    %34 = vector.extract_strided_slice %13 {offsets = [0, 8], sizes = [16, 8], strides = [1, 1]} : vector<16x32xf32> to vector<16x8xf32>
    %35 = vector.extract_strided_slice %14 {offsets = [0, 8], sizes = [16, 8], strides = [1, 1]} : vector<16x32xf32> to vector<16x8xf32>
    %cst_16 = arith.constant dense<0.000000e+00> : vector<16x16xf32>
    %36 = tpu.matmul %33, %34, %cst_16 {dimension_numbers = #tpu.dot_dimension_numbers<[1], [1], [0], [0], [0, 0, 1, 0], [], []>} : vector<16x8xf32>, vector<16x8xf32>, vector<16x16xf32> -> vector<16x16xf32>
    %37 = arith.addf %36, %6 : vector<16x16xf32>
    %cst_17 = arith.constant dense<0xFF800000> : vector<16xf32>
    %38 = vector.multi_reduction <maximumf>, %37, %cst_17 [1] : vector<16x16xf32> to vector<16xf32>
    %39 = vector.shape_cast %38 : vector<16xf32> to vector<16x1xf32>
    %40 = vector.broadcast %39 : vector<16x1xf32> to vector<16x16xf32>
    %41 = arith.subf %37, %40 : vector<16x16xf32>
    %42 = math.exp %41 : vector<16x16xf32>
    %cst_18 = arith.constant dense<0.000000e+00> : vector<16xf32>
    %43 = vector.multi_reduction <add>, %42, %cst_18 [1] : vector<16x16xf32> to vector<16xf32>
    %44 = vector.shape_cast %43 : vector<16xf32> to vector<16x1xf32>
    %45 = tpu.reciprocal %44 {approx = true} : vector<16x1xf32> -> vector<16x1xf32>
    %46 = vector.broadcast %45 : vector<16x1xf32> to vector<16x16xf32>
    %47 = arith.mulf %42, %46 : vector<16x16xf32>
    %cst_19 = arith.constant dense<0.000000e+00> : vector<16x8xf32>
    %48 = tpu.matmul %47, %35, %cst_19 {dimension_numbers = #tpu.dot_dimension_numbers<[1], [0], [0], [1], [0, 0, 1, 1], [], []>} : vector<16x16xf32>, vector<16x8xf32>, vector<16x8xf32> -> vector<16x8xf32>
    %c0_20 = arith.constant 0 : index
    %c8 = arith.constant 8 : index
    %49 = vector.load %arg7[%c0_20, %c8] : memref<16x32xf32, #tpu.memory_space<vmem>>, vector<16x8xf32>
    tpu.vector_store %arg7[%c0_20, %c8], %48 {strides = array<i32>} : memref<16x32xf32, #tpu.memory_space<vmem>>, vector<16x8xf32>,
    %50 = vector.extract_strided_slice %12 {offsets = [0, 16], sizes = [16, 8], strides = [1, 1]} : vector<16x32xf32> to vector<16x8xf32>
    %51 = vector.extract_strided_slice %13 {offsets = [0, 16], sizes = [16, 8], strides = [1, 1]} : vector<16x32xf32> to vector<16x8xf32>
    %52 = vector.extract_strided_slice %14 {offsets = [0, 16], sizes = [16, 8], strides = [1, 1]} : vector<16x32xf32> to vector<16x8xf32>
    %cst_21 = arith.constant dense<0.000000e+00> : vector<16x16xf32>
    %53 = tpu.matmul %50, %51, %cst_21 {dimension_numbers = #tpu.dot_dimension_numbers<[1], [1], [0], [0], [0, 0, 1, 0], [], []>} : vector<16x8xf32>, vector<16x8xf32>, vector<16x16xf32> -> vector<16x16xf32>
    %54 = arith.addf %53, %6 : vector<16x16xf32>
    %cst_22 = arith.constant dense<0xFF800000> : vector<16xf32>
    %55 = vector.multi_reduction <maximumf>, %54, %cst_22 [1] : vector<16x16xf32> to vector<16xf32>
    %56 = vector.shape_cast %55 : vector<16xf32> to vector<16x1xf32>
    %57 = vector.broadcast %56 : vector<16x1xf32> to vector<16x16xf32>
    %58 = arith.subf %54, %57 : vector<16x16xf32>
    %59 = math.exp %58 : vector<16x16xf32>
    %cst_23 = arith.constant dense<0.000000e+00> : vector<16xf32>
    %60 = vector.multi_reduction <add>, %59, %cst_23 [1] : vector<16x16xf32> to vector<16xf32>
    %61 = vector.shape_cast %60 : vector<16xf32> to vector<16x1xf32>
    %62 = tpu.reciprocal %61 {approx = true} : vector<16x1xf32> -> vector<16x1xf32>
    %63 = vector.broadcast %62 : vector<16x1xf32> to vector<16x16xf32>
    %64 = arith.mulf %59, %63 : vector<16x16xf32>
    %cst_24 = arith.constant dense<0.000000e+00> : vector<16x8xf32>
    %65 = tpu.matmul %64, %52, %cst_24 {dimension_numbers = #tpu.dot_dimension_numbers<[1], [0], [0], [1], [0, 0, 1, 1], [], []>} : vector<16x16xf32>, vector<16x8xf32>, vector<16x8xf32> -> vector<16x8xf32>
    %c0_25 = arith.constant 0 : index
    %c16 = arith.constant 16 : index
    %66 = vector.load %arg7[%c0_25, %c16] : memref<16x32xf32, #tpu.memory_space<vmem>>, vector<16x8xf32>
    tpu.vector_store %arg7[%c0_25, %c16], %65 {strides = array<i32>} : memref<16x32xf32, #tpu.memory_space<vmem>>, vector<16x8xf32>,
    %67 = vector.extract_strided_slice %12 {offsets = [0, 24], sizes = [16, 8], strides = [1, 1]} : vector<16x32xf32> to vector<16x8xf32>
    %68 = vector.extract_strided_slice %13 {offsets = [0, 24], sizes = [16, 8], strides = [1, 1]} : vector<16x32xf32> to vector<16x8xf32>
    %69 = vector.extract_strided_slice %14 {offsets = [0, 24], sizes = [16, 8], strides = [1, 1]} : vector<16x32xf32> to vector<16x8xf32>
    %cst_26 = arith.constant dense<0.000000e+00> : vector<16x16xf32>
    %70 = tpu.matmul %67, %68, %cst_26 {dimension_numbers = #tpu.dot_dimension_numbers<[1], [1], [0], [0], [0, 0, 1, 0], [], []>} : vector<16x8xf32>, vector<16x8xf32>, vector<16x16xf32> -> vector<16x16xf32>
    %71 = arith.addf %70, %6 : vector<16x16xf32>
    %cst_27 = arith.constant dense<0xFF800000> : vector<16xf32>
    %72 = vector.multi_reduction <maximumf>, %71, %cst_27 [1] : vector<16x16xf32> to vector<16xf32>
    %73 = vector.shape_cast %72 : vector<16xf32> to vector<16x1xf32>
    %74 = vector.broadcast %73 : vector<16x1xf32> to vector<16x16xf32>
    %75 = arith.subf %71, %74 : vector<16x16xf32>
    %76 = math.exp %75 : vector<16x16xf32>
    %cst_28 = arith.constant dense<0.000000e+00> : vector<16xf32>
    %77 = vector.multi_reduction <add>, %76, %cst_28 [1] : vector<16x16xf32> to vector<16xf32>
    %78 = vector.shape_cast %77 : vector<16xf32> to vector<16x1xf32>
    %79 = tpu.reciprocal %78 {approx = true} : vector<16x1xf32> -> vector<16x1xf32>
    %80 = vector.broadcast %79 : vector<16x1xf32> to vector<16x16xf32>
    %81 = arith.mulf %76, %80 : vector<16x16xf32>
    %cst_29 = arith.constant dense<0.000000e+00> : vector<16x8xf32>
    %82 = tpu.matmul %81, %69, %cst_29 {dimension_numbers = #tpu.dot_dimension_numbers<[1], [0], [0], [1], [0, 0, 1, 1], [], []>} : vector<16x16xf32>, vector<16x8xf32>, vector<16x8xf32> -> vector<16x8xf32>
    %c0_30 = arith.constant 0 : index
    %c24 = arith.constant 24 : index
    %83 = vector.load %arg7[%c0_30, %c24] : memref<16x32xf32, #tpu.memory_space<vmem>>, vector<16x8xf32>
    tpu.vector_store %arg7[%c0_30, %c24], %82 {strides = array<i32>} : memref<16x32xf32, #tpu.memory_space<vmem>>, vector<16x8xf32>,
    %c0_31 = arith.constant 0 : index
    %c0_32 = arith.constant 0 : index
    %84 = vector.load %arg7[%c0_31, %c0_32] : memref<16x32xf32, #tpu.memory_space<vmem>>, vector<16x32xf32>
    %85 = arith.addf %84, %15 : vector<16x32xf32>
    %c0_33 = arith.constant 0 : index
    %c0_34 = arith.constant 0 : index
    %86 = vector.load %arg4[%c0_33, %c0_34] : memref<32x16xf32, #tpu.memory_space<vmem>>, vector<32x16xf32>
    %cst_35 = arith.constant dense<0.000000e+00> : vector<16x16xf32>
    %87 = tpu.matmul %85, %86, %cst_35 {dimension_numbers = #tpu.dot_dimension_numbers<[1], [0], [0], [1], [0, 0, 1, 1], [], []>} : vector<16x32xf32>, vector<32x16xf32>, vector<16x16xf32> -> vector<16x16xf32>
    %c0_36 = arith.constant 0 : index
    %c0_37 = arith.constant 0 : index
    %88 = vector.load %arg5[%c0_36, %c0_37] : memref<1x16xf32, #tpu.memory_space<vmem>>, vector<1x16xf32>
    %89 = vector.broadcast %88 : vector<1x16xf32> to vector<16x16xf32>
    %90 = arith.addf %87, %89 : vector<16x16xf32>
    %91 = vector.extract_strided_slice %90 {offsets = [0, 0], sizes = [16, 4], strides = [1, 1]} : vector<16x16xf32> to vector<16x4xf32>
    %92 = vector.extract_strided_slice %90 {offsets = [0, 4], sizes = [16, 4], strides = [1, 1]} : vector<16x16xf32> to vector<16x4xf32>
    %93 = vector.extract_strided_slice %90 {offsets = [0, 8], sizes = [16, 4], strides = [1, 1]} : vector<16x16xf32> to vector<16x4xf32>
    %94 = vector.extract_strided_slice %90 {offsets = [0, 12], sizes = [16, 4], strides = [1, 1]} : vector<16x16xf32> to vector<16x4xf32>
    %cst_38 = arith.constant dense<0.000000e+00> : vector<16x16xf32>
    %95 = tpu.matmul %91, %92, %cst_38 {dimension_numbers = #tpu.dot_dimension_numbers<[1], [1], [0], [0], [0, 0, 1, 0], [], []>} : vector<16x4xf32>, vector<16x4xf32>, vector<16x16xf32> -> vector<16x16xf32>
    %96 = arith.addf %95, %6 : vector<16x16xf32>
    %cst_39 = arith.constant dense<0xFF800000> : vector<16xf32>
    %97 = vector.multi_reduction <maximumf>, %96, %cst_39 [1] : vector<16x16xf32> to vector<16xf32>
    %98 = vector.shape_cast %97 : vector<16xf32> to vector<16x1xf32>
    %99 = vector.broadcast %98 : vector<16x1xf32> to vector<16x16xf32>
    %100 = arith.subf %96, %99 : vector<16x16xf32>
    %101 = math.exp %100 : vector<16x16xf32>
    %cst_40 = arith.constant dense<0.000000e+00> : vector<16xf32>
    %102 = vector.multi_reduction <add>, %101, %cst_40 [1] : vector<16x16xf32> to vector<16xf32>
    %103 = vector.shape_cast %102 : vector<16xf32> to vector<16x1xf32>
    %104 = tpu.reciprocal %103 {approx = true} : vector<16x1xf32> -> vector<16x1xf32>
    %105 = vector.broadcast %104 : vector<16x1xf32> to vector<16x16xf32>
    %106 = arith.mulf %101, %105 : vector<16x16xf32>
    %cst_41 = arith.constant dense<0.000000e+00> : vector<16x4xf32>
    %107 = tpu.matmul %106, %93, %cst_41 {dimension_numbers = #tpu.dot_dimension_numbers<[1], [0], [0], [1], [0, 0, 1, 1], [], []>} : vector<16x16xf32>, vector<16x4xf32>, vector<16x4xf32> -> vector<16x4xf32>
    %108 = arith.addf %107, %94 : vector<16x4xf32>
    %cst_42 = arith.constant dense<0xFF800000> : vector<16xf32>
    %109 = vector.multi_reduction <maximumf>, %108, %cst_42 [1] : vector<16x4xf32> to vector<16xf32>
    %110 = vector.shape_cast %109 : vector<16xf32> to vector<16x1xf32>
    %111 = vector.broadcast %110 : vector<16x1xf32> to vector<16x4xf32>
    %112 = arith.subf %108, %111 : vector<16x4xf32>
    %113 = math.exp %112 : vector<16x4xf32>
    %cst_43 = arith.constant dense<0.000000e+00> : vector<16xf32>
    %114 = vector.multi_reduction <add>, %113, %cst_43 [1] : vector<16x4xf32> to vector<16xf32>
    %115 = vector.shape_cast %114 : vector<16xf32> to vector<16x1xf32>
    %116 = math.log %115 : vector<16x1xf32>
    %117 = arith.addf %116, %110 : vector<16x1xf32>
    %118 = vector.broadcast %117 : vector<16x1xf32> to vector<16x4xf32>
    %119 = arith.subf %108, %118 : vector<16x4xf32>
    %cst_44 = arith.constant 0.000000e+00 : f32
    %120 = vector.broadcast %cst_44 : f32 to vector<16x128xf32>
    %c0_45 = arith.constant 0 : index
    %c0_46 = arith.constant 0 : index
    %121 = vector.load %arg6[%c0_45, %c0_46] : memref<16x128xf32, #tpu.memory_space<vmem>>, vector<16x128xf32>
    tpu.vector_store %arg6[%c0_45, %c0_46], %120 {strides = array<i32>} : memref<16x128xf32, #tpu.memory_space<vmem>>, vector<16x128xf32>,
    %c0_47 = arith.constant 0 : index
    %c0_48 = arith.constant 0 : index
    %122 = vector.load %arg6[%c0_47, %c0_48] : memref<16x128xf32, #tpu.memory_space<vmem>>, vector<16x4xf32>
    tpu.vector_store %arg6[%c0_47, %c0_48], %119 {strides = array<i32>} : memref<16x128xf32, #tpu.memory_space<vmem>>, vector<16x4xf32>,
    return
  }
}

</mosaic_0001>

<bundles_post_ra>
// kernel: tpu_custom_call.1
= control target key start
LH: loop header
LB: loop body
LE: loop exit
PB: predicated region body
PF: predicated region fallthrough
CT: control target
= control target key end

     0   :  { %vm40_vm0 = vcmask 64512   ;;  %s1909_s0 = inlined_call_operand.vmem [shape: f32[16,8], index: 0, kind: input, shape index: {}]   ;;  %s1910_s1 = inlined_call_operand.vmem [shape: f32[16,16], index: 1, kind: input, shape index: {}]   ;;  %s1911_s2 = inlined_call_operand.vmem [shape: f32[8,128], index: 2, kind: input, shape index: {}]   ;;  %s1912_s3 = inlined_call_operand.vmem [shape: f32[1,128], index: 3, kind: input, shape index: {}]   ;;  %s1913_s4 = inlined_call_operand.vmem [shape: f32[32,16], index: 4, kind: input, shape index: {}]   ;;  %s1914_s5 = inlined_call_operand.vmem [shape: f32[1,16], index: 5, kind: input, shape index: {}]   ;;  %s1915_s6 = inlined_call_operand.hbm [shape: f32[16,128], index: 6, kind: output, shape index: {}]  }
   0x1   :  { %v32_v0 = vld [vmem:[%s1911_s2] sm:$0xff]  ;;  %v25_v2 = vld [vmem:[%s1909_s0 + $0x8] sm:$0xff] }
   0x2   :  { %v24_v1 = vld [vmem:[%s1909_s0] sm:$0xff]  ;;  %1395 = vmatprep.subr.mxu0 %v32_v0 }
   0x3   :  { %1397 = vmatprep.mubr.msk.f32.mxu0 %vm40_vm0, %v24_v1 }
   0x4   :  { %11 = vsyncpa [#allocation4], 0  ;;  %1396 = vmatpush3.msra.mxu0 %v32_v0  ;;  %v1310_v3 = vld [vmem:[%s1912_s3] ss:$0 sm:$0xff]  ;;  %s1682_s0 = smov 96   ;;  %v27_v14 = vld [vmem:[%s1910_s1 + $0x8] sm:$0xff] }
   0x5   :  { %1398 = vmatmul.mubr.msk.f32.vlgmr.msra.gmra.mrb[0].mxu0 %vm40_vm0, %v25_v2  ;;  %vm1765_vm1 = vmpackc.low %vm40_vm0, %vm40_vm0  ;;  %v26_v15 = vld [vmem:[%s1910_s1] sm:$0xff]  ;;  %vm29_vm2 = vcmp.gt.f32.partialorder %v27_v14, 0.0  ;;  %v1683_v16 = vmov -1e+30   ;;  %vm211_vm4 = vcmask 130048   ;;  %s1684_s1 = smov 64  }
   0x6   :  { %vm28_vm3 = vcmp.gt.f32.partialorder %v26_v15, 0.0  ;;  %v1781_v17 = vsel %vm29_vm2, 0.0, %v1683_v16  ;;  %s1685_s7 = smov 88   ;;  %s1686_s8 = smov 120   ;;  %vm531_vm5 = vcmask 130112   ;;  %vm742_vm6 = vcmask 195712  }
   0x7   :  { %v1783_v18 = vsel %vm28_vm3, 0.0, %v1683_v16  ;;  %s1687_s9 = smov 56   ;;  %s1688_s10 = smov 80   ;;  %vm953_vm7 = vcmask 261312   ;;  %vm977_vm8 = vcmask 261120   ;;  %vm1065_vm9 = vcmask 31744  }
   0x8   :  { %s1689_s11 = smov 112   ;;  %s1690_s12 = smov 72   ;;  %vm1530_vm10 = vmpackc.low %vm1065_vm9, %vm1065_vm9 }
   0x9   :  { %s1691_s13 = smov 104   ;;  %s1692_s14 = smov 48  }
   0xa   :  { %s1693_s15 = smov 8   ;;  %s1694_s16 = smov 40  }
   0xb   :  { %s1695_s17 = smov 16   ;;  %s1696_s26 = smov 24  }
   0xc   :  { %s1697_s27 = smov 32   ;;  %s1701_s2 = smov [#allocation3]  }
   0xd   :  { %s1299_s3 = sshll.u32 %s1701_s2, 4  ;;  %s1300_s3 = int_to_ptr.vmem [resolvable:$true] %s1299_s3 }
   0xe   :  { %s1658_s29 = scalar_lea.vmem %s1300_s3, 256  ;;  %p1663_p1 = scmp.lt.s32.totalorder %s1300_s3, %s1300_s3 }
   0xf   :  { %p1659_p0 = scmp.ne.s32.totalorder %s1300_s3, %s1658_s29  ;;  %p1664_p2 = scmp.lt.s32.totalorder %s1658_s29, %s1658_s29 }
  0x11   :  { %p1665_p3 = por %p1664_p2, %p1663_p1 }
  0x13   :  { %p1666_p4 = pnand %p1665_p3, %p1659_p0 }
  0xd8   :  { %v1399_v4 = vpop.f32.mrb[0].mxu0 }
  0xd9   :  { %v1752_v5 = vadd.f32 %v1399_v4, %v1310_v3  ;;  %v113_v6 = vpop.f32.mrb[1].mxu0 }
  0xda   :  { %v1754_v7 = vadd.f32 %v1310_v3, %v113_v6 }
  0xdc   :  { %1404 = vmatprep.mubr.msk.f32.mxu1 %vm40_vm0, %v1754_v7  ;;  %v1760_v8 = vpack.i.bf16 %v1752_v5, %v1754_v7 }
  0xde   :  { %1561 = vrot.lane.b32.xlu0 %v1760_v8, %s1682_s0  ;;  %s1698_s0 = smov 124  }
 0x150   :  { %v1562_v9 = vpop.permute.xlu0 %1561 }
 0x151   :  { %v1564_v10 = vunpack.i.h.bf16 %v1562_v9  ;;  %v1563_v11 = vunpack.i.l.bf16 %v1562_v9 }
 0x153   :  { %v1481_v13 = vpack.c.bf16 %v1564_v10, %v1563_v11 }
 0x155   :  { %1483 = vmatprep.subr.msk.bf16.mxu1 %vm1765_vm1, %v1481_v13 }
 0x156   :  { %1486 = vmatpush3.bf16.xpose.msk.msra.mxu1 %vm1765_vm1, %v1481_v13 }
 0x15d   :  { %1405 = vmatmul.mubr.msk.f32.vlgmr.msra.gmra.mrb[0].mxu1 %vm40_vm0, %v1752_v5 }
 0x230   :  { %v1406_v19 = vpop.f32.mrb[0].mxu1 }
 0x231   :  { %v208_v20 = vadd.f32 %v1406_v19, %v1781_v17  ;;  %v202_v21 = vpop.f32.mrb[1].mxu1 }
 0x232   :  { %v203_v22 = vadd.f32 %v202_v21, %v1783_v18 }
 0x233   :  { %v215_v23 = vsel %vm211_vm4, %v208_v20, -inf }
 0x234   :  { %216 = vmax.xlane.f32.xlu1 %v215_v23  ;;  %v212_v24 = vsel %vm211_vm4, %v203_v22, -inf }
 0x235   :  { %213 = vmax.xlane.f32.xlu0 %v212_v24 }
 0x245   :  { %1566 = vrot.lane.b32.xlu1 %v1760_v8, %s1684_s1 }
 0x249   :  { %1571 = vrot.lane.b32.xlu1 %v1760_v8, %s1685_s7 }
 0x24b   :  { %325 = vrot.lane.b32.xlu0 %v1752_v5, %s1686_s8 }
 0x2c1   :  { %v217_v25 = vpop.xlane.xlu1 %216 }
 0x2c2   :  { %v219_v26 = vsub.f32 %v208_v20, %v217_v25  ;;  %v214_v27 = vpop.xlane.xlu0 %213 }
 0x2c3   :  { %v218_v28 = vsub.f32 %v203_v22, %v214_v27 }
 0x2c4   :  { %v222_v29 = vmul.f32 1.442695, %v219_v26 }
 0x2c5   :  { %v220_v30 = vmul.f32 1.442695, %v218_v28  ;;  %v1567_v31 = vpop.permute.xlu1 %1566 }
 0x2c6   :  { %1610 = vpow2.f32 %v222_v29  ;;  %v1569_v32 = vunpack.i.h.bf16 %v1567_v31  ;;  %v1568_v33 = vunpack.i.l.bf16 %v1567_v31  ;;  %v326_v50 = vpop.permute.xlu0 %325 }
 0x2c7   :  { %1612 = vpow2.f32 %v220_v30 }
 0x2c8   :  { %v1487_v34 = vpack.c.bf16 %v1569_v32, %v1568_v33 }
 0x2c9   :  { %v1572_v35 = vpop.permute.xlu1 %1571 }
 0x2ca   :  { %v1574_v36 = vunpack.i.h.bf16 %v1572_v35  ;;  %v1573_v37 = vunpack.i.l.bf16 %v1572_v35  ;;  %1488 = vmatprep.subr.bf16.mxu0 %v1487_v34 }
 0x2cb   :  { %1490 = vmatpush3.bf16.msra.mxu0 %v1487_v34 }
 0x2cc   :  { %v1491_v38 = vpack.c.bf16 %v1574_v36, %v1573_v37 }
 0x2ce   :  { %1493 = vmatprep.subr.msk.bf16.mxu0 %vm1765_vm1, %v1491_v38 }
 0x2d0   :  { %v1611_v39 = vpop.eup %1610 }
 0x2d1   :  { %v227_v40 = vsel %vm211_vm4, %v1611_v39, 0.0  ;;  %v1613_v41 = vpop.eup %1612 }
 0x2d2   :  { %228 = vadd.xlane.f32.xlu1 %v227_v40  ;;  %v224_v42 = vsel %vm211_vm4, %v1613_v41, 0.0 }
 0x2d6   :  { %225 = vadd.xlane.f32.xlu1 %v224_v42 }
 0x2e7   :  { %323 = vrot.lane.b32.xlu1 %v1754_v7, %s1686_s8 }
 0x35f   :  { %v229_v43 = vpop.xlane.xlu1 %228 }
 0x360   :  { %1614 = vrcp.f32 %v229_v43 }
 0x363   :  { %v226_v44 = vpop.xlane.xlu1 %225 }
 0x364   :  { %1616 = vrcp.f32 %v226_v44 }
 0x367   :  { %v324_v49 = vpop.permute.xlu1 %323 }
 0x36a   :  { %v1615_v45 = vpop.eup %1614 }
 0x36b   :  { %v233_v48 = vmul.f32 %v1615_v45, %v1611_v39 }
 0x36e   :  { %v1617_v46 = vpop.eup %1616 }
 0x36f   :  { %v232_v47 = vmul.f32 %v1617_v46, %v1613_v41 }
 0x371   :  { %1411 = vmatprep.mubr.msk.f32.mxu0 %vm211_vm4, %v232_v47 }
 0x372   :  { %1412 = vmatmul.mubr.msk.f32.vlgmr.msra.gmra.mrb[2].mxu0 %vm211_vm4, %v233_v48 }
 0x373   :  { %1496 = vmatpush3.bf16.xpose.msk.msra.mxu0 %vm1765_vm1, %v1491_v38  ;;  %1418 = vmatprep.mubr.msk.f32.mxu0 %vm40_vm0, %v324_v49 }
 0x37a   :  { %1419 = vmatmul.mubr.msk.f32.vlgmr.msra.gmra.mrb[4].mxu0 %vm40_vm0, %v326_v50 }
 0x445   :  { %v1413_v51 = vpop.f32.mrb[2].mxu0 }
 0x446   :  { %322 = vst.msk [vmem:[#allocation2 + $0x8] sm:$0xff] %vm40_vm0, %v1413_v51  ;;  %v312_v52 = vpop.f32.mrb[3].mxu0 }
 0x447   :  { %321 = vst.msk [vmem:[#allocation2] sm:$0xff] %vm40_vm0, %v312_v52 }
 0x44d   :  { %v1420_v53 = vpop.f32.mrb[4].mxu0 }
 0x44e   :  { %v411_v54 = vadd.f32 %v1420_v53, %v1781_v17  ;;  %v405_v55 = vpop.f32.mrb[5].mxu0 }
 0x44f   :  { %v406_v56 = vadd.f32 %v405_v55, %v1783_v18 }
 0x450   :  { %v417_v57 = vsel %vm211_vm4, %v411_v54, -inf }
 0x451   :  { %418 = vmax.xlane.f32.xlu0 %v417_v57  ;;  %v414_v58 = vsel %vm211_vm4, %v406_v56, -inf }
 0x452   :  { %415 = vmax.xlane.f32.xlu1 %v414_v58 }
 0x463   :  { %1576 = vrot.lane.b32.xlu1 %v1760_v8, %s1687_s9 }
 0x467   :  { %1581 = vrot.lane.b32.xlu0 %v1760_v8, %s1688_s10  ;;  %534 = vrot.lane.b32.xlu1 %v1754_v7, %s1689_s11 }
 0x4de   :  { %v419_v59 = vpop.xlane.xlu0 %418 }
 0x4df   :  { %v421_v60 = vsub.f32 %v411_v54, %v419_v59  ;;  %v416_v61 = vpop.xlane.xlu1 %415 }
 0x4e0   :  { %v420_v62 = vsub.f32 %v406_v56, %v416_v61 }
 0x4e1   :  { %v424_v63 = vmul.f32 1.442695, %v421_v60 }
 0x4e2   :  { %v422_v0 = vmul.f32 1.442695, %v420_v62  ;;  %v1582_v1 = vpop.permute.xlu0 %1581 }
 0x4e3   :  { %1618 = vpow2.f32 %v424_v63  ;;  %v1577_v2 = vpop.permute.xlu1 %1576  ;;  %v1584_v3 = vunpack.i.h.bf16 %v1582_v1  ;;  %v1583_v4 = vunpack.i.l.bf16 %v1582_v1 }
 0x4e4   :  { %v1579_v6 = vunpack.i.h.bf16 %v1577_v2  ;;  %v1578_v9 = vunpack.i.l.bf16 %v1577_v2  ;;  %1620 = vpow2.f32 %v422_v0 }
 0x4e5   :  { %v1501_v11 = vpack.c.bf16 %v1584_v3, %v1583_v4 }
 0x4e6   :  { %v1497_v10 = vpack.c.bf16 %v1579_v6, %v1578_v9 }
 0x4e7   :  { %v535_v19 = vpop.permute.xlu1 %534 }
 0x4e8   :  { %1498 = vmatprep.subr.bf16.mxu1 %v1497_v10 }
 0x4e9   :  { %1500 = vmatpush3.bf16.msra.mxu1 %v1497_v10 }
 0x4ea   :  { %1503 = vmatprep.subr.msk.bf16.mxu1 %vm1765_vm1, %v1501_v11 }
 0x4ed   :  { %v1619_v13 = vpop.eup %1618 }
 0x4ee   :  { %v429_v14 = vsel %vm211_vm4, %v1619_v13, 0.0  ;;  %v1621_v15 = vpop.eup %1620 }
 0x4ef   :  { %430 = vadd.xlane.f32.xlu1 %v429_v14  ;;  %v426_v16 = vsel %vm211_vm4, %v1621_v15, 0.0 }
 0x4f3   :  { %427 = vadd.xlane.f32.xlu1 %v426_v16 }
 0x504   :  { %536 = vrot.lane.b32.xlu1 %v1752_v5, %s1689_s11 }
 0x57c   :  { %v431_v20 = vpop.xlane.xlu1 %430 }
 0x57d   :  { %1622 = vrcp.f32 %v431_v20 }
 0x580   :  { %v428_v21 = vpop.xlane.xlu1 %427 }
 0x581   :  { %1624 = vrcp.f32 %v428_v21 }
 0x584   :  { %v537_v26 = vpop.permute.xlu1 %536 }
 0x587   :  { %v1623_v22 = vpop.eup %1622 }
 0x588   :  { %v435_v25 = vmul.f32 %v1623_v22, %v1619_v13 }
 0x58b   :  { %v1625_v23 = vpop.eup %1624 }
 0x58c   :  { %v434_v24 = vmul.f32 %v1625_v23, %v1621_v15 }
 0x58e   :  { %1425 = vmatprep.mubr.msk.f32.mxu1 %vm211_vm4, %v434_v24 }
 0x58f   :  { %1426 = vmatmul.mubr.msk.f32.vlgmr.msra.gmra.mrb[2].mxu1 %vm211_vm4, %v435_v25 }
 0x590   :  { %1506 = vmatpush3.bf16.xpose.msk.msra.mxu1 %vm1765_vm1, %v1501_v11  ;;  %1432 = vmatprep.mubr.msk.f32.mxu1 %vm40_vm0, %v535_v19 }
 0x597   :  { %1433 = vmatmul.mubr.msk.f32.vlgmr.msra.gmra.mrb[4].mxu1 %vm40_vm0, %v537_v26 }
 0x662   :  { %v1825_v27 = vpop.f32.mrb[2].mxu1 }
 0x663   :  { %v1827_v28 = vpop.f32.mrb[3].mxu1 }
 0x66a   :  { %v1434_v29 = vpop.f32.mrb[4].mxu1 }
 0x66b   :  { %v622_v30 = vadd.f32 %v1434_v29, %v1781_v17  ;;  %v616_v31 = vpop.f32.mrb[5].mxu1 }
 0x66c   :  { %v617_v32 = vadd.f32 %v616_v31, %v1783_v18 }
 0x66d   :  { %v628_v33 = vsel %vm211_vm4, %v622_v30, -inf }
 0x66e   :  { %629 = vmax.xlane.f32.xlu0 %v628_v33  ;;  %v625_v34 = vsel %vm211_vm4, %v617_v32, -inf  ;;  %v966_v33 = vld [vmem:[%s1913_s4] sm:$0xff] }
 0x66f   :  { %626 = vmax.xlane.f32.xlu1 %v625_v34  ;;  %v967_v34 = vld [vmem:[%s1913_s4 + $0x8] sm:$0xff] }
 0x6fb   :  { %v630_v35 = vpop.xlane.xlu0 %629 }
 0x6fc   :  { %v632_v36 = vsub.f32 %v622_v30, %v630_v35  ;;  %v627_v37 = vpop.xlane.xlu1 %626  ;;  %v1521_v35 = vpack.c.bf16 %v967_v34, %v966_v33 }
 0x6fd   :  { %v631_v38 = vsub.f32 %v617_v32, %v627_v37  ;;  %v969_v37 = vld [vmem:[%s1913_s4 + $0x18] sm:$0xff] }
 0x6fe   :  { %v635_v39 = vmul.f32 1.442695, %v632_v36  ;;  %v968_v36 = vld [vmem:[%s1913_s4 + $0x10] sm:$0xff] }
 0x6ff   :  { %v633_v40 = vmul.f32 1.442695, %v631_v38  ;;  %v1525_v38 = vpack.c.bf16 %v969_v37, %v968_v36 }
 0x700   :  { %1626 = vpow2.f32 %v635_v39 }
 0x701   :  { %1628 = vpow2.f32 %v633_v40 }
 0x70a   :  { %v1627_v41 = vpop.eup %1626 }
 0x70b   :  { %v1629_v42 = vpop.eup %1628  ;;  %v640_v43 = vsel %vm211_vm4, %v1627_v41, 0.0 }
 0x70c   :  { %641 = vadd.xlane.f32.xlu1 %v640_v43  ;;  %v637_v44 = vsel %vm211_vm4, %v1629_v42, 0.0 }
 0x70d   :  { %638 = vadd.xlane.f32.xlu0 %v637_v44 }
 0x71d   :  { %1591 = vrot.lane.b32.xlu1 %v1760_v8, %s1690_s12 }
 0x721   :  { %745 = vrot.lane.b32.xlu1 %v1754_v7, %s1691_s13 }
 0x723   :  { %1586 = vrot.lane.b32.xlu0 %v1760_v8, %s1692_s14 }
 0x727   :  { %747 = vrot.lane.b32.xlu0 %v1752_v5, %s1691_s13 }
 0x799   :  { %v642_v45 = vpop.xlane.xlu1 %641 }
 0x79a   :  { %1630 = vrcp.f32 %v642_v45  ;;  %v639_v46 = vpop.xlane.xlu0 %638 }
 0x79b   :  { %1632 = vrcp.f32 %v639_v46 }
 0x79d   :  { %v1592_v47 = vpop.permute.xlu1 %1591 }
 0x79e   :  { %v1587_v48 = vpop.permute.xlu0 %1586  ;;  %v1594_v49 = vunpack.i.h.bf16 %v1592_v47  ;;  %v1593_v50 = vunpack.i.l.bf16 %v1592_v47 }
 0x79f   :  { %v1589_v51 = vunpack.i.h.bf16 %v1587_v48  ;;  %v1588_v52 = vunpack.i.l.bf16 %v1587_v48 }
 0x7a0   :  { %v1511_v54 = vpack.c.bf16 %v1594_v49, %v1593_v50 }
 0x7a1   :  { %v1507_v53 = vpack.c.bf16 %v1589_v51, %v1588_v52  ;;  %v746_v59 = vpop.permute.xlu1 %745 }
 0x7a2   :  { %v748_v60 = vpop.permute.xlu0 %747 }
 0x7a3   :  { %1508 = vmatprep.subr.bf16.mxu0 %v1507_v53 }
 0x7a4   :  { %v1631_v55 = vpop.eup %1630  ;;  %1510 = vmatpush3.bf16.msra.mxu0 %v1507_v53 }
 0x7a5   :  { %v1633_v56 = vpop.eup %1632  ;;  %1513 = vmatprep.subr.msk.bf16.mxu0 %vm1765_vm1, %v1511_v54  ;;  %v646_v58 = vmul.f32 %v1631_v55, %v1627_v41 }
 0x7a6   :  { %v645_v57 = vmul.f32 %v1633_v56, %v1629_v42 }
 0x7a8   :  { %1439 = vmatprep.mubr.msk.f32.mxu0 %vm211_vm4, %v645_v57 }
 0x7a9   :  { %1440 = vmatmul.mubr.msk.f32.vlgmr.msra.gmra.mrb[6].mxu0 %vm211_vm4, %v646_v58 }
 0x7aa   :  { %1446 = vmatprep.mubr.msk.f32.mxu0 %vm40_vm0, %v746_v59 }
 0x7ad   :  { %1516 = vmatpush3.bf16.xpose.msk.msra.mxu0 %vm1765_vm1, %v1511_v54 }
 0x7b4   :  { %1447 = vmatmul.mubr.msk.f32.vlgmr.msra.gmra.mrb[8].mxu0 %vm40_vm0, %v748_v60 }
 0x87c   :  { %v1441_v61 = vpop.f32.mrb[6].mxu0 }
 0x87d   :  { %v725_v62 = vpop.f32.mrb[7].mxu0 }
 0x887   :  { %v1448_v63 = vpop.f32.mrb[8].mxu0 }
 0x888   :  { %v833_v0 = vadd.f32 %v1448_v63, %v1781_v17  ;;  %v827_v1 = vpop.f32.mrb[9].mxu0 }
 0x889   :  { %v828_v2 = vadd.f32 %v827_v1, %v1783_v18 }
 0x88a   :  { %v839_v3 = vsel %vm211_vm4, %v833_v0, -inf }
 0x88b   :  { %840 = vmax.xlane.f32.xlu0 %v839_v3  ;;  %v836_v4 = vsel %vm211_vm4, %v828_v2, -inf }
 0x88c   :  { %837 = vmax.xlane.f32.xlu1 %v836_v4 }
 0x918   :  { %v841_v6 = vpop.xlane.xlu0 %840 }
 0x919   :  { %v843_v12 = vsub.f32 %v833_v0, %v841_v6  ;;  %v838_v9 = vpop.xlane.xlu1 %837 }
 0x91a   :  { %v842_v10 = vsub.f32 %v828_v2, %v838_v9 }
 0x91b   :  { %v846_v11 = vmul.f32 1.442695, %v843_v12 }
 0x91c   :  { %v844_v13 = vmul.f32 1.442695, %v842_v10 }
 0x91d   :  { %1634 = vpow2.f32 %v846_v11 }
 0x91e   :  { %1636 = vpow2.f32 %v844_v13 }
 0x927   :  { %v1635_v14 = vpop.eup %1634 }
 0x928   :  { %v1637_v15 = vpop.eup %1636  ;;  %v851_v16 = vsel %vm211_vm4, %v1635_v14, 0.0 }
 0x929   :  { %852 = vadd.xlane.f32.xlu1 %v851_v16  ;;  %v848_v19 = vsel %vm211_vm4, %v1637_v15, 0.0 }
 0x92a   :  { %849 = vadd.xlane.f32.xlu0 %v848_v19 }
 0x93a   :  { %525 = vrot.lane.b32.xlu1 %v1827_v28, %s1693_s15 }
 0x93e   :  { %527 = vrot.lane.b32.xlu1 %v1825_v27, %s1693_s15 }
 0x940   :  { %1596 = vrot.lane.b32.xlu0 %v1760_v8, %s1694_s16 }
 0x942   :  { %738 = vrot.lane.b32.xlu1 %v1441_v61, %s1695_s17 }
 0x944   :  { %736 = vrot.lane.b32.xlu0 %v725_v62, %s1695_s17 }
 0x9b6   :  { %v853_v20 = vpop.xlane.xlu1 %852 }
 0x9b7   :  { %1638 = vrcp.f32 %v853_v20  ;;  %v850_v21 = vpop.xlane.xlu0 %849 }
 0x9b8   :  { %1640 = vrcp.f32 %v850_v21 }
 0x9ba   :  { %v526_v22 = vpop.permute.xlu1 %525 }
 0x9bb   :  { %532 = vst.msk [vmem:[#allocation2] sm:$0xff] %vm531_vm5, %v526_v22  ;;  %v1597_v23 = vpop.permute.xlu0 %1596 }
 0x9bc   :  { %v1599_v24 = vunpack.i.h.bf16 %v1597_v23  ;;  %v1598_v25 = vunpack.i.l.bf16 %v1597_v23 }
 0x9be   :  { %v1517_v26 = vpack.c.bf16 %v1599_v24, %v1598_v25  ;;  %v528_v28 = vpop.permute.xlu1 %527 }
 0x9bf   :  { %533 = vst.msk [vmem:[#allocation2 + $0x8] sm:$0xff] %vm531_vm5, %v528_v28  ;;  %v737_v27 = vpop.permute.xlu0 %736 }
 0x9c0   :  { %743 = vst.msk [vmem:[#allocation2] sm:$0xff] %vm742_vm6, %v737_v27  ;;  %1518 = vmatprep.subr.bf16.mxu1 %v1517_v26 }
 0x9c1   :  { %v1639_v8 = vpop.eup %1638  ;;  %1520 = vmatpush3.bf16.msra.mxu1 %v1517_v26 }
 0x9c2   :  { %v1641_v29 = vpop.eup %1640  ;;  %v739_v30 = vpop.permute.xlu1 %738  ;;  %v857_v32 = vmul.f32 %v1639_v8, %v1635_v14  ;;  %1522 = vmatprep.subr.bf16.mxu1 %v1521_v35 }
 0x9c3   :  { %744 = vst.msk [vmem:[#allocation2 + $0x8] sm:$0xff] %vm742_vm6, %v739_v30  ;;  %v856_v31 = vmul.f32 %v1641_v29, %v1637_v15 }
 0x9c5   :  { %1453 = vmatprep.mubr.msk.f32.mxu1 %vm211_vm4, %v856_v31 }
 0x9c6   :  { %1454 = vmatmul.mubr.msk.f32.vlgmr.msra.gmra.mrb[6].mxu1 %vm211_vm4, %v857_v32 }
 0x9c7   :  { %1524 = vmatpush3.bf16.msra.mxu1 %v1521_v35 }
 0x9c8   :  { %1526 = vmatprep.subr.bf16.mxu1 %v1525_v38 }
 0x9cb   :  { %1528 = vmatpush3.bf16.msra.mxu1 %v1525_v38 }
 0xa99   :  { %v1455_v39 = vpop.f32.mrb[6].mxu1 }
 0xa9a   :  { %949 = vrot.lane.b32.xlu1 %v1455_v39, %s1696_s26  ;;  %v936_v40 = vpop.f32.mrb[7].mxu1  ;;  %v1700_v39 = vmov 0.0  }
 0xa9b   :  { %947 = vrot.lane.b32.xlu0 %v936_v40, %s1696_s26  ;;  %1290 = vst [vmem:[#allocation3] sm:$0xff] %v1700_v39  ;;  %1291 = vst [vmem:[#allocation3 + $0x8] sm:$0xff] %v1700_v39 }
 0xa9e   :  { %960 = vrot.lane.b32.xlu1 %v1752_v5, %s1697_s27  ;;  %v1337_v5 = vld [vmem:[%s1914_s5] ss:$0 sm:$0xff]  ;;  %s1699_s5 = smov 116  }
 0xa9f   :  { %958 = vrot.lane.b32.xlu0 %v1754_v7, %s1697_s27 }
 0xb0c   :  { %v950_v41 = vpop.permute.xlu1 %949 }
 0xb0d   :  { %955 = vst.msk [vmem:[#allocation2 + $0x8] sm:$0xff] %vm953_vm7, %v950_v41  ;;  %v948_v42 = vpop.permute.xlu0 %947 }
 0xb0e   :  { %954 = vst.msk [vmem:[#allocation2] sm:$0xff] %vm953_vm7, %v948_v42 }
 0xb10   :  { %v961_v46 = vpop.permute.xlu1 %960 }
 0xb11   :  { %v959_v44 = vpop.permute.xlu0 %958 }
 0xb14   :  { %v957_v43 = vld [vmem:[#allocation2 + $0x8] sm:$0xff] }
 0xb15   :  { %v956_v45 = vld [vmem:[#allocation2] sm:$0xff]  ;;  %v965_v48 = vadd.f32 %v961_v46, %v957_v43 }
 0xb16   :  { %v964_v47 = vadd.f32 %v959_v44, %v956_v45 }
 0xb18   :  { %1464 = vmatprep.mubr.msk.f32.mxu1 %vm977_vm8, %v964_v47 }
 0xb19   :  { %1465 = vmatmul.mubr.msk.f32.vlgmr.msra.gmra.mrb[8].mxu1 %vm977_vm8, %v965_v48 }
 0xbec   :  { %v1466_v49 = vpop.f32.mrb[8].mxu1 }
 0xbed   :  { %v1056_v7 = vadd.f32 %v1466_v49, %v1337_v5  ;;  %v1050_v50 = vpop.f32.mrb[9].mxu1 }
 0xbee   :  { %v1051_v51 = vadd.f32 %v1337_v5, %v1050_v50 }
 0xbf0   :  { %1471 = vmatprep.mubr.msk.f32.mxu0 %vm1065_vm9, %v1051_v51  ;;  %v1600_v52 = vpack.i.bf16 %v1056_v7, %v1051_v51 }
 0xbf2   :  { %1601 = vrot.lane.b32.xlu0 %v1600_v52, %s1698_s0 }
 0xc64   :  { %v1602_v53 = vpop.permute.xlu0 %1601 }
 0xc65   :  { %v1604_v54 = vunpack.i.h.bf16 %v1602_v53  ;;  %v1603_v55 = vunpack.i.l.bf16 %v1602_v53 }
 0xc67   :  { %v1529_v56 = vpack.c.bf16 %v1604_v54, %v1603_v55 }
 0xc69   :  { %1531 = vmatprep.subr.msk.bf16.mxu0 %vm1530_vm10, %v1529_v56 }
 0xc6a   :  { %1534 = vmatpush3.bf16.xpose.msk.msra.mxu0 %vm1530_vm10, %v1529_v56 }
 0xc71   :  { %1472 = vmatmul.mubr.msk.f32.vlgmr.msra.gmra.mrb[10].mxu0 %vm1065_vm9, %v1056_v7 }
 0xd44   :  { %v1473_v57 = vpop.f32.mrb[10].mxu0 }
 0xd45   :  { %v1146_v58 = vadd.f32 %v1473_v57, %v1781_v17  ;;  %v1140_v59 = vpop.f32.mrb[11].mxu0 }
 0xd46   :  { %v1141_v60 = vadd.f32 %v1140_v59, %v1783_v18 }
 0xd47   :  { %v1152_v61 = vsel %vm211_vm4, %v1146_v58, -inf }
 0xd48   :  { %1153 = vmax.xlane.f32.xlu0 %v1152_v61  ;;  %v1149_v62 = vsel %vm211_vm4, %v1141_v60, -inf }
 0xd49   :  { %1150 = vmax.xlane.f32.xlu1 %v1149_v62 }
 0xdd5   :  { %v1154_v63 = vpop.xlane.xlu0 %1153 }
 0xdd6   :  { %v1156_v0 = vsub.f32 %v1146_v58, %v1154_v63  ;;  %v1151_v1 = vpop.xlane.xlu1 %1150 }
 0xdd7   :  { %v1155_v2 = vsub.f32 %v1141_v60, %v1151_v1 }
 0xdd8   :  { %v1159_v3 = vmul.f32 1.442695, %v1156_v0 }
 0xdd9   :  { %v1157_v4 = vmul.f32 1.442695, %v1155_v2 }
 0xdda   :  { %1642 = vpow2.f32 %v1159_v3 }
 0xddb   :  { %1644 = vpow2.f32 %v1157_v4 }
 0xde4   :  { %v1643_v6 = vpop.eup %1642 }
 0xde5   :  { %v1645_v12 = vpop.eup %1644  ;;  %v1164_v17 = vsel %vm211_vm4, %v1643_v6, 0.0 }
 0xde6   :  { %1165 = vadd.xlane.f32.xlu1 %v1164_v17  ;;  %v1161_v18 = vsel %vm211_vm4, %v1645_v12, 0.0 }
 0xde7   :  { %1162 = vadd.xlane.f32.xlu0 %v1161_v18 }
 0xdf7   :  { %1177 = vrot.lane.b32.xlu1 %v1051_v51, %s1699_s5 }
 0xdfb   :  { %1179 = vrot.lane.b32.xlu1 %v1056_v7, %s1699_s5 }
 0xdfd   :  { %1606 = vrot.lane.b32.xlu0 %v1600_v52, %s1686_s8 }
 0xe73   :  { %v1166_v9 = vpop.xlane.xlu1 %1165 }
 0xe74   :  { %1646 = vrcp.f32 %v1166_v9  ;;  %v1163_v10 = vpop.xlane.xlu0 %1162 }
 0xe75   :  { %1648 = vrcp.f32 %v1163_v10 }
 0xe77   :  { %v1178_v22 = vpop.permute.xlu1 %1177 }
 0xe78   :  { %v1607_v11 = vpop.permute.xlu0 %1606 }
 0xe79   :  { %v1609_v13 = vunpack.i.h.bf16 %v1607_v11  ;;  %v1608_v14 = vunpack.i.l.bf16 %v1607_v11 }
 0xe7b   :  { %v1535_v15 = vpack.c.bf16 %v1609_v13, %v1608_v14  ;;  %v1180_v23 = vpop.permute.xlu1 %1179 }
 0xe7d   :  { %1536 = vmatprep.subr.bf16.mxu1 %v1535_v15 }
 0xe7e   :  { %v1647_v16 = vpop.eup %1646  ;;  %1538 = vmatpush3.bf16.msra.mxu1 %v1535_v15 }
 0xe7f   :  { %v1649_v19 = vpop.eup %1648  ;;  %v1170_v21 = vmul.f32 %v1647_v16, %v1643_v6 }
 0xe80   :  { %v1169_v20 = vmul.f32 %v1649_v19, %v1645_v12 }
 0xe82   :  { %1478 = vmatprep.mubr.msk.f32.mxu1 %vm211_vm4, %v1169_v20 }
 0xe83   :  { %1479 = vmatmul.mubr.msk.f32.vlgmr.msra.gmra.mrb[10].mxu1 %vm211_vm4, %v1170_v21 }
 0xf56   :  { %v1480_v24 = vpop.f32.mrb[10].mxu1 }
 0xf57   :  { %v1261_v25 = vadd.f32 %v1480_v24, %v1180_v23  ;;  %v1255_v26 = vpop.f32.mrb[11].mxu1 }
 0xf58   :  { %v1256_v28 = vadd.f32 %v1255_v26, %v1178_v22 }
 0xf59   :  { %v1267_v27 = vsel %vm1065_vm9, %v1261_v25, -inf }
 0xf5a   :  { %1268 = vmax.xlane.f32.xlu1 %v1267_v27  ;;  %v1264_v8 = vsel %vm1065_vm9, %v1256_v28, -inf }
 0xf5b   :  { %1265 = vmax.xlane.f32.xlu0 %v1264_v8 }
 0xfe7   :  { %v1269_v29 = vpop.xlane.xlu1 %1268 }
 0xfe8   :  { %v1271_v30 = vsub.f32 %v1261_v25, %v1269_v29  ;;  %v1266_v31 = vpop.xlane.xlu0 %1265 }
 0xfe9   :  { %v1270_v32 = vsub.f32 %v1256_v28, %v1266_v31 }
 0xfea   :  { %v1274_v33 = vmul.f32 1.442695, %v1271_v30 }
 0xfeb   :  { %v1272_v34 = vmul.f32 1.442695, %v1270_v32 }
 0xfed   :  { %1650 = vpow2.f32 %v1272_v34 }
 0xfee   :  { %1652 = vpow2.f32 %v1274_v33 }
 0xff7   :  { %v1651_v35 = vpop.eup %1650 }
 0xff8   :  { %v1276_v36 = vsel %vm1065_vm9, %v1651_v35, 0.0  ;;  %v1653_v37 = vpop.eup %1652 }
 0xff9   :  { %1277 = vadd.xlane.f32.xlu0 %v1276_v36  ;;  %v1279_v38 = vsel %vm1065_vm9, %v1653_v37, 0.0 }
 0xffd   :  { %1280 = vadd.xlane.f32.xlu0 %v1279_v38 }
0x1086   :  { %v1278_v40 = vpop.xlane.xlu0 %1277 }
0x1087   :  { %1654 = vlog2.f32 %v1278_v40 }
0x108a   :  { %v1281_v41 = vpop.xlane.xlu0 %1280 }
0x108b   :  { %1656 = vlog2.f32 %v1281_v41 }
0x1091   :  { %v1655_v42 = vpop.eup %1654 }
0x1092   :  { %v1283_v43 = vmul.f32 0.6931472, %v1655_v42 }
0x1094   :  { %v1286_v44 = vadd.f32 %v1283_v43, %v1266_v31 }
0x1095   :  { %v1657_v45 = vpop.eup %1656 }
0x1096   :  { %v1288_v46 = vsub.f32 %v1256_v28, %v1286_v44  ;;  %v1285_v47 = vmul.f32 0.6931472, %v1657_v45 }
0x1098   :  { %v1287_v48 = vadd.f32 %v1285_v47, %v1269_v29  ;;  %1292 = vst.msk [vmem:[#allocation3] sm:$0xff] %vm1065_vm9, %v1288_v46 }
0x109a   :  { %v1289_v5 = vsub.f32 %v1261_v25, %v1287_v48 }
0x109c   :  { %1293 = vst.msk [vmem:[#allocation3 + $0x8] sm:$0xff] %vm1065_vm9, %v1289_v5 }
0x109d   :  { %1669 = shalt.err (!%p1666_p4)
}
0x109e   :  { %s1670_s7 = scalar_lea.hbm %s1915_s6, 256 }
0x109f   :  { %p1671_p5 = scmp.ne.s32.totalorder %s1915_s6, %s1670_s7  ;;  %p1674_p6 = scmp.lt.u32.totalorder %s1670_s7, %s1915_s6 }
0x10a1   :  { %p1676_p7 = pnand %p1674_p6, %p1671_p5 }
0x10a3   :  { %1679 = shalt.err (!%p1676_p7)
}
0x10a4   :  { %s1702_s12 = smov 128  }
0x10a5   :  { %1305 = dma.vmem_to_hbm [thread:$0]  %s1300_s3, 256, %s1915_s6, [#allocation4], %s1702_s12, %s1702_s12, %s1693_s15  }
0x10a6   :  { %1680 = dma.done.wait [#allocation4], 256  }
0x10a7   :  { %1681 = vsyncadd [#allocation4], 4294967040 }
0x10a8   :  { %1309 = vsyncpa [#allocation4], 1 }

</bundles_post_ra>
